<compile_context>
chip_gen: v6e
topology: v6e:2x2x1
jax: 0.10.0
libtpu: 0.0.40
codegen_flags: <defaults>
</compile_context>

<pallas_src>
import functools

import jax
import jax.numpy as jnp
from jax import lax
from jax.experimental import pallas as pl
from jax.experimental.pallas import tpu as pltpu


def _pick_tile(dim, preferred):
    """Largest MXU-friendly tile that evenly divides `dim`, else full extent."""
    for t in (preferred, 512, 256, 128):
        if t is not None and t <= dim and dim % t == 0:
            return t
    return dim  # small / ragged dims: full extent (allowed by BlockSpec rules)


def _row_mean_kernel(x_ref, mu_ref, *, inv_m):
    k = pl.program_id(0)

    @pl.when(k == 0)
    def _():
        mu_ref[...] = jnp.zeros_like(mu_ref)

    mu_ref[...] += jnp.sum(x_ref[...].astype(jnp.float32), axis=1, keepdims=True)

    @pl.when(k == pl.num_programs(0) - 1)
    def _():
        mu_ref[...] *= jnp.float32(inv_m)


def _cov_orth_kernel(lhs_ref, rhs_ref, mu_i_ref, mu_full_ref, out_ref,
                     s_acc, sq_acc, *, inv_m1, use_bf16):
    k = pl.program_id(1)

    @pl.when(k == 0)
    def _():
        s_acc[...] = jnp.zeros_like(s_acc)
        sq_acc[0, 0] = jnp.float32(0.0)

    # center with the precomputed global row means (two-pass: no cancellation)
    xc_l = lhs_ref[...].astype(jnp.float32) - mu_i_ref[...]      # [tn, tm]
    xc_r = rhs_ref[...].astype(jnp.float32) - mu_full_ref[...]   # [N,  tm]

    # running sum_j xc[r, j]^2 over this row block -> (m-1) * trace contribution
    sq_acc[0, 0] += jnp.sum(xc_l * xc_l)

    if use_bf16:
        xl = xc_l.astype(jnp.bfloat16)
        xr = xc_r.astype(jnp.bfloat16)
    else:
        xl, xr = xc_l, xc_r

    # S_block += Xc_block @ Xc_full^T  (transpose folded into the MXU operand)
    s_acc[...] += lax.dot_general(
        xl, xr,
        dimension_numbers=(((1,), (1,)), ((), ())),
        preferred_element_type=jnp.float32)

    @pl.when(k == pl.num_programs(1) - 1)
    def _():
        s = s_acc[...]
        inv = jnp.float32(inv_m1)
        sum_sq_cov = jnp.sum(s * s) * (inv * inv)   # sum(cov_block^2)
        trace_part = sq_acc[0, 0] * inv             # sum of diag(cov) rows here
        tile_n = s_acc.shape[0]
        partial = sum_sq_cov - 2.0 * trace_part + jnp.float32(tile_n)
        out_ref[...] = jnp.full(out_ref.shape, partial, dtype=jnp.float32)


def cov_orthogonality_loss(fx, *, tile_n=None, tile_m=None):
    """fx: [N, m] with N == m (required by the original module's broadcasting)."""
    n, m = fx.shape
    if n != m:
        raise ValueError("torch.cov(fx) - eye(fx.shape[1]) requires N == m")

    tn = _pick_tile(n, tile_n if tile_n is not None else 256)
    tm = _pick_tile(m, tile_m if tile_m is not None else 256)

    # ---- pass 1: per-variable (row) means, tiled over observations ----------
    mu = pl.pallas_call(
        functools.partial(_row_mean_kernel, inv_m=1.0 / m),
        out_shape=jax.ShapeDtypeStruct((n, 1), jnp.float32),
        grid=(m // tm,),
        in_specs=[pl.BlockSpec((n, tm), lambda k: (0, k))],
        out_specs=pl.BlockSpec((n, 1), lambda k: (0, 0)),
        compiler_params=pltpu.CompilerParams(
            dimension_semantics=("arbitrary",)),
    )(fx)

    # ---- pass 2: centered Gram + algebraic loss reduction -------------------
    num_i = n // tn
    num_k = m // tm
    use_bf16 = fx.dtype == jnp.bfloat16

    # rough per-step VMEM (double-buffered inputs + N^2/num_i accumulator)
    est = (2 * tn * tm * 4 + 2 * n * tm * 4 + 2 * (tn + n) * 4
           + tn * n * 4 + 8 * 128 * 4)
    vmem_limit = int(min(max(2 * est, 32 * 1024 * 1024), 100 * 1024 * 1024))

    partials = pl.pallas_call(
        functools.partial(_cov_orth_kernel,
                          inv_m1=1.0 / (m - 1), use_bf16=use_bf16),
        out_shape=jax.ShapeDtypeStruct((num_i, 8, 128), jnp.float32),
        grid=(num_i, num_k),
        in_specs=[
            pl.BlockSpec((tn, tm), lambda i, k: (i, k)),   # row block of fx
            pl.BlockSpec((n, tm), lambda i, k: (0, k)),    # all rows of fx
            pl.BlockSpec((tn, 1), lambda i, k: (i, 0)),    # mu rows for block
            pl.BlockSpec((n, 1), lambda i, k: (0, 0)),     # full mu
        ],
        out_specs=pl.BlockSpec((1, 8, 128), lambda i, k: (i, 0, 0)),
        scratch_shapes=[pltpu.VMEM((tn, n), jnp.float32),
                        pltpu.SMEM((1, 1), jnp.float32)],
        compiler_params=pltpu.CompilerParams(
            dimension_semantics=("parallel", "arbitrary"),
            vmem_limit_bytes=vmem_limit),
    )(fx, fx, mu, mu)

    return jnp.sum(partials[:, 0, 0])


def _reference(fx):
    x = fx.astype(jnp.float32)
    m = x.shape[1]
    xc = x - jnp.mean(x, axis=1, keepdims=True)
    cov = (xc @ xc.T) / (m - 1)
    return jnp.sum((cov - jnp.eye(x.shape[0], dtype=jnp.float32)) ** 2)


if __name__ == "__main__":
    key = jax.random.PRNGKey(0)
    # small square input (N == m required by the module); tiles of 128 give a
    # (2 row-blocks x 2 reduction-steps) grid so the pipeline is exercised.
    n = m = 256
    fx = jax.random.normal(key, (n, m), dtype=jnp.float32)

    loss = cov_orthogonality_loss(fx, tile_n=128, tile_m=128)
    loss = jax.block_until_ready(loss)

    ref = jax.block_until_ready(_reference(fx))
    assert jnp.allclose(loss, ref, rtol=1e-4, atol=1e-2), (loss, ref)

    print("KERNEL_OK")
</pallas_src>

<mosaic_0001>
module attributes {stable_mosaic.version = 11 : i64} {
  func.func @_row_mean_kernel(%arg0: i32, %arg1: memref<256x128xf32, #tpu.memory_space<vmem>>, %arg2: memref<256x1xf32, #tpu.memory_space<vmem>>) attributes {dimension_semantics = [#tpu.dimension_semantics<arbitrary>], iteration_bounds = array<i64: 2>, scalar_prefetch = 0 : i64, scratch_operands = 0 : i64, tpu.core_type = #tpu.core_type<tc>, window_params = [{transform_indices = @transform_0, window_bounds = array<i64: 256, 128>}, {pipeline_mode = #tpu.pipeline_mode<synchronous>, transform_indices = @transform_1, window_bounds = array<i64: 256, 1>}]} {
    %c0_i32 = arith.constant 0 : i32
    %0 = arith.cmpi eq, %arg0, %c0_i32 : i32
    %1 = arith.extui %0 : i1 to i32
    %c0_i32_0 = arith.constant 0 : i32
    %2 = arith.cmpi ne, %1, %c0_i32_0 : i32
    scf.if %2 {
      %cst_7 = arith.constant 0.000000e+00 : f32
      %12 = vector.broadcast %cst_7 : f32 to vector<256x1xf32>
      %c0_8 = arith.constant 0 : index
      %c0_9 = arith.constant 0 : index
      %13 = vector.load %arg2[%c0_8, %c0_9] : memref<256x1xf32, #tpu.memory_space<vmem>>, vector<256x1xf32>
      tpu.vector_store %arg2[%c0_8, %c0_9], %12 {strides = array<i32>} : memref<256x1xf32, #tpu.memory_space<vmem>>, vector<256x1xf32>,
    } else {
    }
    %c0 = arith.constant 0 : index
    %c0_1 = arith.constant 0 : index
    %3 = vector.load %arg2[%c0, %c0_1] : memref<256x1xf32, #tpu.memory_space<vmem>>, vector<256x1xf32>
    %c0_2 = arith.constant 0 : index
    %c0_3 = arith.constant 0 : index
    %4 = vector.load %arg1[%c0_2, %c0_3] : memref<256x128xf32, #tpu.memory_space<vmem>>, vector<256x128xf32>
    %cst = arith.constant dense<0.000000e+00> : vector<256xf32>
    %5 = vector.multi_reduction <add>, %4, %cst [1] : vector<256x128xf32> to vector<256xf32>
    %6 = vector.shape_cast %5 : vector<256xf32> to vector<256x1xf32>
    %7 = arith.addf %3, %6 : vector<256x1xf32>
    %c0_4 = arith.constant 0 : index
    %c0_5 = arith.constant 0 : index
    %8 = vector.load %arg2[%c0_4, %c0_5] : memref<256x1xf32, #tpu.memory_space<vmem>>, vector<256x1xf32>
    tpu.vector_store %arg2[%c0_4, %c0_5], %7 {strides = array<i32>} : memref<256x1xf32, #tpu.memory_space<vmem>>, vector<256x1xf32>,
    %c1_i32 = arith.constant 1 : i32
    %9 = arith.cmpi eq, %arg0, %c1_i32 : i32
    %10 = arith.extui %9 : i1 to i32
    %c0_i32_6 = arith.constant 0 : i32
    %11 = arith.cmpi ne, %10, %c0_i32_6 : i32
    scf.if %11 {
      %c0_7 = arith.constant 0 : index
      %c0_8 = arith.constant 0 : index
      %12 = vector.load %arg2[%c0_7, %c0_8] : memref<256x1xf32, #tpu.memory_space<vmem>>, vector<256x1xf32>
      %cst_9 = arith.constant 3.906250e-03 : f32
      %13 = vector.broadcast %cst_9 : f32 to vector<256x1xf32>
      %14 = arith.mulf %12, %13 : vector<256x1xf32>
      %c0_10 = arith.constant 0 : index
      %c0_11 = arith.constant 0 : index
      %15 = vector.load %arg2[%c0_10, %c0_11] : memref<256x1xf32, #tpu.memory_space<vmem>>, vector<256x1xf32>
      tpu.vector_store %arg2[%c0_10, %c0_11], %14 {strides = array<i32>} : memref<256x1xf32, #tpu.memory_space<vmem>>, vector<256x1xf32>,
    } else {
    }
    return
  }
  func.func @transform_0(%arg0: i32) -> (i32, i32) {
    %c0_i32 = arith.constant 0 : i32
    %c0_i32_0 = arith.constant 0 : i32
    return %c0_i32, %arg0 : i32, i32
  }
  func.func @transform_1(%arg0: i32) -> (i32, i32) {
    %c0_i32 = arith.constant 0 : i32
    %c0_i32_0 = arith.constant 0 : i32
    %c0_i32_1 = arith.constant 0 : i32
    return %c0_i32, %c0_i32_0 : i32, i32
  }
}

</mosaic_0001>

<bundles_post_ra>
// kernel: tpu_custom_call.1
= control target key start
LH: loop header
LB: loop body
LE: loop exit
PB: predicated region body
PF: predicated region fallthrough
CT: control target
= control target key end

     0   :  { %6 = vsyncpa [#allocation3], 0  ;;  %s1329_s0 = inlined_call_operand.hbm [shape: f32[256,256], index: 0, kind: input, shape index: {}]   ;;  %s1330_s1 = inlined_call_operand.vmem [shape: f32[256,1], index: 1, kind: output, shape index: {}]  }
   0x1   :  { %8 = vsyncpa [#allocation3 + $0x1], 0  ;;  %s623_s6 = smov 0   ;;  %s625_s7 = smov 0  }
   0x2   :  { %s627_s8 = smov 0   ;;  %s629_s9 = smov 0  }
   0x3 LB: > { %s642_s10 = sadd.s32 4294967295, %s606_s9   ;;  %s645_s11 = sadd.s32 1, %s606_s9   ;;  %s606_s9 = sphi %s629_s9, %s1338_s9   ;;  %s602_s8 = sphi %s627_s8, %s1337_s8   ;;  %s598_s7 = sphi %s625_s7, %s1336_s7   ;;  %s594_s6 = sphi %s623_s6, %s1335_s6  }
   0x4   : > { %s18_s12 = ssub.s32 %s606_s9, %s645_s11  ;;  %s21_s13 = sadd.s32 1, %s602_s8 }
   0x5   : > { %p19_p0 = scmp.eq.s32.totalorder %s18_s12, 0  ;;  %p28_p1 = scmp.ne.s32.totalorder %s602_s8, %s598_s7 }
   0x6   : > { %p29_p2 = scmp.eq.s32.totalorder %s606_s9, 0  ;;  %p34_p3 = scmp.ne.s32.totalorder %s598_s7, %s594_s6 }
   0x7   : > { %s655_s14 = scalar_select %p19_p0, %s602_s8, %s21_s13  }
   0x8   : > { %p30_p4 = por %p29_p2, %p28_p1  ;;  %p35_p5 = scmp.eq.s32.totalorder %s642_s10, 0 }
   0x9   : > { %p507_p6 = scmp.lt.s32.totalorder %s606_s9, 2  ;;  %s79_s16 = sand.u32 1, %s602_s8  }
   0xa   : > { %p659_p7 = por %p35_p5, %p34_p3  ;;  %s493_s17 = sshll.u32 %s79_s16, 8 }
   0xb   : > { %s494_s18 = sshll.u32 %s606_s9, 7  ;;  %s83_s22 = scalar_lea.vmem [#allocation2], %s493_s17 }
   0xc   : > { %s1332_s15 = scalar_select %p659_p7, 1, 0 }
   0xd   : > { %s668_s21 = scalar_lea.hbm %s1329_s0, %s494_s18  ;;  %s89_s23 = sshll.u32 %s83_s22, 4  ;;  %s670_s23 = int_to_ptr.vmem [resolvable:$true] %s89_s23 }
   0xe   : > { %p672_p8 = pnand %p507_p6, %p30_p4  ;;  %s676_s25 = scalar_lea.sflag [#allocation3], %s79_s16 }
   0xf   : > { %s544_s26 = scalar_lea.hbm %s668_s21, 4096  ;;  %s549_s29 = scalar_lea.hbm %s1329_s0, 8192 }
  0x10   : > { %p545_p9 = scmp.ne.s32.totalorder %s668_s21, %s544_s26  ;;  %p546_p10 = pneg %p672_p8 }
  0x11   : > { %p550_p13 = scmp.lt.s32.totalorder %s668_s21, %s1329_s0  ;;  %p551_p0 = scmp.lt.s32.totalorder %s549_s29, %s544_s26 }
  0x12   : > { %p547_p11 = pnand %p546_p10, %p545_p9 }
  0x13   : > { %p552_p1 = por %p551_p0, %p550_p13 }
  0x14   : > { %p548_p12 = pneg %p547_p11 }
  0x16   : > { %p553_p2 = pnand %p552_p1, %p548_p12 }
  0x18   : > { %556 = shalt.err (!%p553_p2)
}
  0x19   : > { %s557_s3 = scalar_lea.vmem %s670_s23, 4096  ;;  %s608_s4 = smov [#allocation2]  }
  0x1a   : > { %p558_p3 = scmp.ne.s32.totalorder %s670_s23, %s557_s3  ;;  %s562_s5 = sshll.u32 %s608_s4, 4  ;;  %s563_s5 = int_to_ptr.vmem [resolvable:$false] %s562_s5 }
  0x1b   : > { %s564_s6 = scalar_lea.vmem %s563_s5, 8192  ;;  %p565_p6 = scmp.lt.s32.totalorder %s670_s23, %s563_s5 }
  0x1c   : > { %p560_p4 = pnand %p558_p3, %p546_p10  ;;  %p566_p9 = scmp.lt.s32.totalorder %s564_s6, %s557_s3 }
  0x1e   : > { %p561_p5 = pneg %p560_p4  ;;  %p567_p11 = por %p566_p9, %p565_p6 }
  0x20   : > { %p568_p7 = pnand %p567_p11, %p561_p5 }
  0x22   : > { %571 = shalt.err (!%p568_p7)
}
  0x23   : > { %s609_s12 = smov 256   ;;  %s610_s13 = smov 128  }
  0x24   : > { %s611_s16 = smov 8   ;;  %p495_p10 = scmp.ge.s32.totalorder %s606_s9, 1 }
  0x25   : > { %506 = dma.hbm_to_vmem [thread:$0]  (!%p672_p8), %s668_s21, 4096, %s670_s23, %s676_s25, %s609_s12, %s610_s13, %s611_s16  }
  0x26   : > { %p97_p12 = scmp.lt.s32.totalorder %s606_s9, 3 }
  0x28   : > { %p98_p13 = pnand %p495_p10, %p97_p12 }
  0x29   : > { %s103_s17 = sand.u32 (!%p98_p13), 1, %s598_s7   ;;  %p1334_p7 = scmp.ne.s32.totalorder (!%p98_p13), %s1332_s15, 0 }
  0x2a   : > { %101 = sbr.rel (%p98_p13) target bundleno = 293 (0x125), region = 24  ;;  %s496_s18 = sshll.u32 (!%p98_p13), %s103_s17, 8 }
  0x2b   : > { %s104_s19 = scalar_lea.sflag (!%p98_p13), [#allocation3], %s103_s17  ;;  %s700_s20 = scalar_lea.vmem (!%p98_p13), [#allocation2], %s496_s18 }
  0x2f   : > { %589 = dma.done.wait (%p1334_p7), %s104_s19, 4096  }
  0x30   : > { %591 = vsyncadd (%p1334_p7), %s104_s19, 4294963200  ;;  %p497_p0 = scmp.ne.s32.totalorder %s642_s10, 0 }
  0x32   : > { %124 = sbr.rel (%p497_p0) target bundleno = 72 (0x48), region = 32 }
  0x37   : > { %vm125_vm0 = vcmask 7168   ;;  %v612_v0 = vmov 0.0  }
  0x38   : > { %126 = vst.msk [vmem:[%s1330_s1] sm:$0xff] %vm125_vm0, %v612_v0  ;;  %127 = vst.msk [vmem:[%s1330_s1 + $0x8] sm:$0xff] %vm125_vm0, %v612_v0 }
  0x39   : > { %128 = vst.msk [vmem:[%s1330_s1 + $0x10] sm:$0xff] %vm125_vm0, %v612_v0  ;;  %129 = vst.msk [vmem:[%s1330_s1 + $0x18] sm:$0xff] %vm125_vm0, %v612_v0 }
  0x3a   : > { %130 = vst.msk [vmem:[%s1330_s1 + $0x20] sm:$0xff] %vm125_vm0, %v612_v0  ;;  %131 = vst.msk [vmem:[%s1330_s1 + $0x28] sm:$0xff] %vm125_vm0, %v612_v0 }
  0x3b   : > { %132 = vst.msk [vmem:[%s1330_s1 + $0x30] sm:$0xff] %vm125_vm0, %v612_v0  ;;  %133 = vst.msk [vmem:[%s1330_s1 + $0x38] sm:$0xff] %vm125_vm0, %v612_v0 }
  0x3c   : > { %134 = vst.msk [vmem:[%s1330_s1 + $0x40] sm:$0xff] %vm125_vm0, %v612_v0  ;;  %135 = vst.msk [vmem:[%s1330_s1 + $0x48] sm:$0xff] %vm125_vm0, %v612_v0 }
  0x3d   : > { %136 = vst.msk [vmem:[%s1330_s1 + $0x50] sm:$0xff] %vm125_vm0, %v612_v0  ;;  %137 = vst.msk [vmem:[%s1330_s1 + $0x58] sm:$0xff] %vm125_vm0, %v612_v0 }
  0x3e   : > { %138 = vst.msk [vmem:[%s1330_s1 + $0x60] sm:$0xff] %vm125_vm0, %v612_v0  ;;  %139 = vst.msk [vmem:[%s1330_s1 + $0x68] sm:$0xff] %vm125_vm0, %v612_v0 }
  0x3f   : > { %140 = vst.msk [vmem:[%s1330_s1 + $0x70] sm:$0xff] %vm125_vm0, %v612_v0  ;;  %141 = vst.msk [vmem:[%s1330_s1 + $0x78] sm:$0xff] %vm125_vm0, %v612_v0 }
  0x40   : > { %142 = vst.msk [vmem:[%s1330_s1 + $0x80] sm:$0xff] %vm125_vm0, %v612_v0  ;;  %143 = vst.msk [vmem:[%s1330_s1 + $0x88] sm:$0xff] %vm125_vm0, %v612_v0 }
  0x41   : > { %144 = vst.msk [vmem:[%s1330_s1 + $0x90] sm:$0xff] %vm125_vm0, %v612_v0  ;;  %145 = vst.msk [vmem:[%s1330_s1 + $0x98] sm:$0xff] %vm125_vm0, %v612_v0 }
  0x42   : > { %146 = vst.msk [vmem:[%s1330_s1 + $0xa0] sm:$0xff] %vm125_vm0, %v612_v0  ;;  %147 = vst.msk [vmem:[%s1330_s1 + $0xa8] sm:$0xff] %vm125_vm0, %v612_v0 }
  0x43   : > { %148 = vst.msk [vmem:[%s1330_s1 + $0xb0] sm:$0xff] %vm125_vm0, %v612_v0  ;;  %149 = vst.msk [vmem:[%s1330_s1 + $0xb8] sm:$0xff] %vm125_vm0, %v612_v0 }
  0x44   : > { %150 = vst.msk [vmem:[%s1330_s1 + $0xc0] sm:$0xff] %vm125_vm0, %v612_v0  ;;  %151 = vst.msk [vmem:[%s1330_s1 + $0xc8] sm:$0xff] %vm125_vm0, %v612_v0 }
  0x45   : > { %152 = vst.msk [vmem:[%s1330_s1 + $0xd0] sm:$0xff] %vm125_vm0, %v612_v0  ;;  %153 = vst.msk [vmem:[%s1330_s1 + $0xd8] sm:$0xff] %vm125_vm0, %v612_v0 }
  0x46   : > { %154 = vst.msk [vmem:[%s1330_s1 + $0xe0] sm:$0xff] %vm125_vm0, %v612_v0  ;;  %155 = vst.msk [vmem:[%s1330_s1 + $0xe8] sm:$0xff] %vm125_vm0, %v612_v0 }
  0x47   : > { %156 = vst.msk [vmem:[%s1330_s1 + $0xf0] sm:$0xff] %vm125_vm0, %v612_v0  ;;  %157 = vst.msk [vmem:[%s1330_s1 + $0xf8] sm:$0xff] %vm125_vm0, %v612_v0 }
  0x48 PF: > { %v192_v1 = vld [vmem:[%s700_s20 + $0x10] sm:$0xff]  ;;  %v190_v2 = vld [vmem:[%s700_s20] sm:$0xff]  ;;  %v193_v3 = vld [vmem:[%s700_s20 + $0x18] sm:$0xff]  ;;  %vm318_vm1 = vcmask 7168   ;;  %p498_p8 = scmp.ne.s32.totalorder %s642_s10, 1 }
  0x49   : > { %226 = vadd.xlane.f32.xlu1 %v192_v1  ;;  %222 = vadd.xlane.f32.xlu0 %v190_v2  ;;  %v191_v4 = vld [vmem:[%s700_s20 + $0x8] sm:$0xff]  ;;  %v194_v6 = vld [vmem:[%s700_s20 + $0x20] sm:$0xff]  ;;  %v197_v7 = vld [vmem:[%s700_s20 + $0x38] sm:$0xff] }
  0x4a   : > { %v195_v5 = vld [vmem:[%s700_s20 + $0x28] sm:$0xff]  ;;  %v196_v8 = vld [vmem:[%s700_s20 + $0x30] sm:$0xff]  ;;  %v198_v10 = vld [vmem:[%s700_s20 + $0x40] sm:$0xff] }
  0x4b   : > { %v199_v9 = vld [vmem:[%s700_s20 + $0x48] sm:$0xff]  ;;  %v201_v11 = vld [vmem:[%s700_s20 + $0x58] sm:$0xff]  ;;  %v200_v12 = vld [vmem:[%s700_s20 + $0x50] sm:$0xff] }
  0x4c   : > { %v203_v13 = vld [vmem:[%s700_s20 + $0x68] sm:$0xff]  ;;  %v202_v14 = vld [vmem:[%s700_s20 + $0x60] sm:$0xff]  ;;  %v205_v15 = vld [vmem:[%s700_s20 + $0x78] sm:$0xff] }
  0x4d   : > { %228 = vadd.xlane.f32.xlu1 %v193_v3  ;;  %224 = vadd.xlane.f32.xlu0 %v191_v4  ;;  %v204_v16 = vld [vmem:[%s700_s20 + $0x70] sm:$0xff]  ;;  %v207_v17 = vld [vmem:[%s700_s20 + $0x88] sm:$0xff]  ;;  %v206_v18 = vld [vmem:[%s700_s20 + $0x80] sm:$0xff] }
  0x4e   : > { %v209_v19 = vld [vmem:[%s700_s20 + $0x98] sm:$0xff]  ;;  %v208_v20 = vld [vmem:[%s700_s20 + $0x90] sm:$0xff]  ;;  %v211_v21 = vld [vmem:[%s700_s20 + $0xa8] sm:$0xff] }
  0x4f   : > { %v210_v22 = vld [vmem:[%s700_s20 + $0xa0] sm:$0xff]  ;;  %v213_v23 = vld [vmem:[%s700_s20 + $0xb8] sm:$0xff]  ;;  %v212_v24 = vld [vmem:[%s700_s20 + $0xb0] sm:$0xff] }
  0x50   : > { %v215_v25 = vld [vmem:[%s700_s20 + $0xc8] sm:$0xff]  ;;  %v214_v26 = vld [vmem:[%s700_s20 + $0xc0] sm:$0xff]  ;;  %v217_v27 = vld [vmem:[%s700_s20 + $0xd8] sm:$0xff] }
  0x51   : > { %232 = vadd.xlane.f32.xlu1 %v195_v5  ;;  %230 = vadd.xlane.f32.xlu0 %v194_v6  ;;  %v216_v28 = vld [vmem:[%s700_s20 + $0xd0] sm:$0xff]  ;;  %v219_v29 = vld [vmem:[%s700_s20 + $0xe8] sm:$0xff]  ;;  %v218_v30 = vld [vmem:[%s700_s20 + $0xe0] sm:$0xff] }
  0x52   : > { %v221_v31 = vld [vmem:[%s700_s20 + $0xf8] sm:$0xff]  ;;  %v220_v32 = vld [vmem:[%s700_s20 + $0xf0] sm:$0xff]  ;;  %v158_v34 = vld [vmem:[%s1330_s1] sm:$0xff] }
  0x53   : > { %v160_v33 = vld [vmem:[%s1330_s1 + $0x10] sm:$0xff]  ;;  %v161_v39 = vld [vmem:[%s1330_s1 + $0x18] sm:$0xff]  ;;  %v159_v40 = vld [vmem:[%s1330_s1 + $0x8] sm:$0xff] }
  0x54   : > { %v163_v45 = vld [vmem:[%s1330_s1 + $0x28] sm:$0xff]  ;;  %v162_v46 = vld [vmem:[%s1330_s1 + $0x20] sm:$0xff]  ;;  %v165_v51 = vld [vmem:[%s1330_s1 + $0x38] sm:$0xff] }
  0x55   : > { %236 = vadd.xlane.f32.xlu1 %v197_v7  ;;  %234 = vadd.xlane.f32.xlu0 %v196_v8  ;;  %v164_v52 = vld [vmem:[%s1330_s1 + $0x30] sm:$0xff]  ;;  %v167_v57 = vld [vmem:[%s1330_s1 + $0x48] sm:$0xff]  ;;  %v166_v58 = vld [vmem:[%s1330_s1 + $0x40] sm:$0xff] }
  0x56   : > { %v169_v63 = vld [vmem:[%s1330_s1 + $0x58] sm:$0xff]  ;;  %v168_v0 = vld [vmem:[%s1330_s1 + $0x50] sm:$0xff]  ;;  %v171_v5 = vld [vmem:[%s1330_s1 + $0x68] sm:$0xff] }
  0x57   : > { %v170_v6 = vld [vmem:[%s1330_s1 + $0x60] sm:$0xff] }
  0x59   : > { %240 = vadd.xlane.f32.xlu1 %v199_v9  ;;  %238 = vadd.xlane.f32.xlu0 %v198_v10 }
  0x5d   : > { %244 = vadd.xlane.f32.xlu1 %v201_v11  ;;  %242 = vadd.xlane.f32.xlu0 %v200_v12  ;;  %v173_v11 = vld [vmem:[%s1330_s1 + $0x78] sm:$0xff]  ;;  %v172_v12 = vld [vmem:[%s1330_s1 + $0x70] sm:$0xff] }
  0x61   : > { %248 = vadd.xlane.f32.xlu1 %v203_v13  ;;  %246 = vadd.xlane.f32.xlu0 %v202_v14 }
  0x65   : > { %252 = vadd.xlane.f32.xlu1 %v205_v15  ;;  %250 = vadd.xlane.f32.xlu0 %v204_v16 }
  0x69   : > { %256 = vadd.xlane.f32.xlu1 %v207_v17  ;;  %254 = vadd.xlane.f32.xlu0 %v206_v18  ;;  %v175_v17 = vld [vmem:[%s1330_s1 + $0x88] sm:$0xff]  ;;  %v174_v18 = vld [vmem:[%s1330_s1 + $0x80] sm:$0xff] }
  0x6d   : > { %260 = vadd.xlane.f32.xlu1 %v209_v19  ;;  %258 = vadd.xlane.f32.xlu0 %v208_v20 }
  0x71   : > { %264 = vadd.xlane.f32.xlu1 %v211_v21  ;;  %262 = vadd.xlane.f32.xlu0 %v210_v22 }
  0x75   : > { %268 = vadd.xlane.f32.xlu1 %v213_v23  ;;  %266 = vadd.xlane.f32.xlu0 %v212_v24  ;;  %v177_v23 = vld [vmem:[%s1330_s1 + $0x98] sm:$0xff]  ;;  %v176_v24 = vld [vmem:[%s1330_s1 + $0x90] sm:$0xff] }
  0x79   : > { %272 = vadd.xlane.f32.xlu1 %v215_v25  ;;  %270 = vadd.xlane.f32.xlu0 %v214_v26 }
  0x7d   : > { %276 = vadd.xlane.f32.xlu1 %v217_v27  ;;  %274 = vadd.xlane.f32.xlu0 %v216_v28 }
  0x81   : > { %280 = vadd.xlane.f32.xlu1 %v219_v29  ;;  %278 = vadd.xlane.f32.xlu0 %v218_v30  ;;  %v179_v29 = vld [vmem:[%s1330_s1 + $0xa8] sm:$0xff]  ;;  %v178_v30 = vld [vmem:[%s1330_s1 + $0xa0] sm:$0xff] }
  0x85   : > { %284 = vadd.xlane.f32.xlu1 %v221_v31  ;;  %282 = vadd.xlane.f32.xlu0 %v220_v32 }
  0xd2   : > { %v227_v35 = vpop.xlane.xlu1 %226  ;;  %v223_v36 = vpop.xlane.xlu0 %222 }
  0xd3   : > { %v288_v37 = vadd.f32 %v227_v35, %v160_v33  ;;  %v286_v38 = vadd.f32 %v223_v36, %v158_v34  ;;  %v181_v35 = vld [vmem:[%s1330_s1 + $0xb8] sm:$0xff]  ;;  %v180_v36 = vld [vmem:[%s1330_s1 + $0xb0] sm:$0xff] }
  0xd5   : > { %321 = vst.msk [vmem:[%s1330_s1 + $0x10] sm:$0xff] %vm318_vm1, %v288_v37  ;;  %319 = vst.msk [vmem:[%s1330_s1] sm:$0xff] %vm318_vm1, %v286_v38 }
  0xd6   : > { %v229_v41 = vpop.xlane.xlu1 %228  ;;  %v225_v42 = vpop.xlane.xlu0 %224 }
  0xd7   : > { %v289_v43 = vadd.f32 %v229_v41, %v161_v39  ;;  %v287_v44 = vadd.f32 %v225_v42, %v159_v40  ;;  %v183_v41 = vld [vmem:[%s1330_s1 + $0xc8] sm:$0xff]  ;;  %v182_v42 = vld [vmem:[%s1330_s1 + $0xc0] sm:$0xff] }
  0xd9   : > { %322 = vst.msk [vmem:[%s1330_s1 + $0x18] sm:$0xff] %vm318_vm1, %v289_v43  ;;  %320 = vst.msk [vmem:[%s1330_s1 + $0x8] sm:$0xff] %vm318_vm1, %v287_v44 }
  0xda   : > { %v233_v47 = vpop.xlane.xlu1 %232  ;;  %v231_v48 = vpop.xlane.xlu0 %230 }
  0xdb   : > { %v291_v49 = vadd.f32 %v233_v47, %v163_v45  ;;  %v290_v50 = vadd.f32 %v231_v48, %v162_v46  ;;  %v185_v47 = vld [vmem:[%s1330_s1 + $0xd8] sm:$0xff]  ;;  %v184_v48 = vld [vmem:[%s1330_s1 + $0xd0] sm:$0xff] }
  0xdd   : > { %324 = vst.msk [vmem:[%s1330_s1 + $0x28] sm:$0xff] %vm318_vm1, %v291_v49  ;;  %323 = vst.msk [vmem:[%s1330_s1 + $0x20] sm:$0xff] %vm318_vm1, %v290_v50 }
  0xde   : > { %v237_v53 = vpop.xlane.xlu1 %236  ;;  %v235_v54 = vpop.xlane.xlu0 %234 }
  0xdf   : > { %v293_v55 = vadd.f32 %v237_v53, %v165_v51  ;;  %v292_v56 = vadd.f32 %v235_v54, %v164_v52  ;;  %v187_v53 = vld [vmem:[%s1330_s1 + $0xe8] sm:$0xff]  ;;  %v186_v54 = vld [vmem:[%s1330_s1 + $0xe0] sm:$0xff] }
  0xe1   : > { %326 = vst.msk [vmem:[%s1330_s1 + $0x38] sm:$0xff] %vm318_vm1, %v293_v55  ;;  %325 = vst.msk [vmem:[%s1330_s1 + $0x30] sm:$0xff] %vm318_vm1, %v292_v56 }
  0xe2   : > { %v241_v59 = vpop.xlane.xlu1 %240  ;;  %v239_v60 = vpop.xlane.xlu0 %238 }
  0xe3   : > { %v295_v61 = vadd.f32 %v241_v59, %v167_v57  ;;  %v294_v62 = vadd.f32 %v239_v60, %v166_v58  ;;  %v189_v59 = vld [vmem:[%s1330_s1 + $0xf8] sm:$0xff]  ;;  %v188_v60 = vld [vmem:[%s1330_s1 + $0xf0] sm:$0xff] }
  0xe5   : > { %328 = vst.msk [vmem:[%s1330_s1 + $0x48] sm:$0xff] %vm318_vm1, %v295_v61  ;;  %327 = vst.msk [vmem:[%s1330_s1 + $0x40] sm:$0xff] %vm318_vm1, %v294_v62 }
  0xe6   : > { %v245_v1 = vpop.xlane.xlu1 %244  ;;  %v243_v2 = vpop.xlane.xlu0 %242 }
  0xe7   : > { %v297_v3 = vadd.f32 %v245_v1, %v169_v63  ;;  %v296_v4 = vadd.f32 %v243_v2, %v168_v0 }
  0xe9   : > { %330 = vst.msk [vmem:[%s1330_s1 + $0x58] sm:$0xff] %vm318_vm1, %v297_v3  ;;  %329 = vst.msk [vmem:[%s1330_s1 + $0x50] sm:$0xff] %vm318_vm1, %v296_v4 }
  0xea   : > { %v249_v7 = vpop.xlane.xlu1 %248  ;;  %v247_v8 = vpop.xlane.xlu0 %246 }
  0xeb   : > { %v299_v9 = vadd.f32 %v249_v7, %v171_v5  ;;  %v298_v10 = vadd.f32 %v247_v8, %v170_v6 }
  0xed   : > { %332 = vst.msk [vmem:[%s1330_s1 + $0x68] sm:$0xff] %vm318_vm1, %v299_v9  ;;  %331 = vst.msk [vmem:[%s1330_s1 + $0x60] sm:$0xff] %vm318_vm1, %v298_v10 }
  0xee   : > { %v253_v13 = vpop.xlane.xlu1 %252  ;;  %v251_v14 = vpop.xlane.xlu0 %250 }
  0xef   : > { %v301_v15 = vadd.f32 %v253_v13, %v173_v11  ;;  %v300_v16 = vadd.f32 %v251_v14, %v172_v12 }
  0xf1   : > { %334 = vst.msk [vmem:[%s1330_s1 + $0x78] sm:$0xff] %vm318_vm1, %v301_v15  ;;  %333 = vst.msk [vmem:[%s1330_s1 + $0x70] sm:$0xff] %vm318_vm1, %v300_v16 }
  0xf2   : > { %v257_v19 = vpop.xlane.xlu1 %256  ;;  %v255_v20 = vpop.xlane.xlu0 %254 }
  0xf3   : > { %v303_v21 = vadd.f32 %v257_v19, %v175_v17  ;;  %v302_v22 = vadd.f32 %v255_v20, %v174_v18 }
  0xf5   : > { %336 = vst.msk [vmem:[%s1330_s1 + $0x88] sm:$0xff] %vm318_vm1, %v303_v21  ;;  %335 = vst.msk [vmem:[%s1330_s1 + $0x80] sm:$0xff] %vm318_vm1, %v302_v22 }
  0xf6   : > { %v261_v25 = vpop.xlane.xlu1 %260  ;;  %v259_v26 = vpop.xlane.xlu0 %258 }
  0xf7   : > { %v305_v27 = vadd.f32 %v261_v25, %v177_v23  ;;  %v304_v28 = vadd.f32 %v259_v26, %v176_v24 }
  0xf9   : > { %338 = vst.msk [vmem:[%s1330_s1 + $0x98] sm:$0xff] %vm318_vm1, %v305_v27  ;;  %337 = vst.msk [vmem:[%s1330_s1 + $0x90] sm:$0xff] %vm318_vm1, %v304_v28 }
  0xfa   : > { %v265_v31 = vpop.xlane.xlu1 %264  ;;  %v263_v32 = vpop.xlane.xlu0 %262 }
  0xfb   : > { %v307_v33 = vadd.f32 %v265_v31, %v179_v29  ;;  %v306_v34 = vadd.f32 %v263_v32, %v178_v30 }
  0xfd   : > { %340 = vst.msk [vmem:[%s1330_s1 + $0xa8] sm:$0xff] %vm318_vm1, %v307_v33  ;;  %339 = vst.msk [vmem:[%s1330_s1 + $0xa0] sm:$0xff] %vm318_vm1, %v306_v34 }
  0xfe   : > { %v269_v37 = vpop.xlane.xlu1 %268  ;;  %v267_v38 = vpop.xlane.xlu0 %266 }
  0xff   : > { %v309_v39 = vadd.f32 %v269_v37, %v181_v35  ;;  %v308_v40 = vadd.f32 %v267_v38, %v180_v36 }
 0x101   : > { %342 = vst.msk [vmem:[%s1330_s1 + $0xb8] sm:$0xff] %vm318_vm1, %v309_v39  ;;  %341 = vst.msk [vmem:[%s1330_s1 + $0xb0] sm:$0xff] %vm318_vm1, %v308_v40 }
 0x102   : > { %v273_v43 = vpop.xlane.xlu1 %272  ;;  %v271_v44 = vpop.xlane.xlu0 %270 }
 0x103   : > { %v311_v45 = vadd.f32 %v273_v43, %v183_v41  ;;  %v310_v46 = vadd.f32 %v271_v44, %v182_v42 }
 0x105   : > { %344 = vst.msk [vmem:[%s1330_s1 + $0xc8] sm:$0xff] %vm318_vm1, %v311_v45  ;;  %343 = vst.msk [vmem:[%s1330_s1 + $0xc0] sm:$0xff] %vm318_vm1, %v310_v46 }
 0x106   : > { %v277_v49 = vpop.xlane.xlu1 %276  ;;  %v275_v50 = vpop.xlane.xlu0 %274 }
 0x107   : > { %v313_v51 = vadd.f32 %v277_v49, %v185_v47  ;;  %v312_v52 = vadd.f32 %v275_v50, %v184_v48 }
 0x109   : > { %346 = vst.msk [vmem:[%s1330_s1 + $0xd8] sm:$0xff] %vm318_vm1, %v313_v51  ;;  %345 = vst.msk [vmem:[%s1330_s1 + $0xd0] sm:$0xff] %vm318_vm1, %v312_v52 }
 0x10a   : > { %v281_v55 = vpop.xlane.xlu1 %280  ;;  %v279_v56 = vpop.xlane.xlu0 %278 }
 0x10b   : > { %v315_v57 = vadd.f32 %v281_v55, %v187_v53  ;;  %v314_v58 = vadd.f32 %v279_v56, %v186_v54 }
 0x10d   : > { %348 = vst.msk [vmem:[%s1330_s1 + $0xe8] sm:$0xff] %vm318_vm1, %v315_v57  ;;  %347 = vst.msk [vmem:[%s1330_s1 + $0xe0] sm:$0xff] %vm318_vm1, %v314_v58  ;;  %354 = sbr.rel (%p498_p8) target bundleno = 293 (0x125), region = 36 }
 0x10e   : > { %v285_v61 = vpop.xlane.xlu1 %284  ;;  %v283_v62 = vpop.xlane.xlu0 %282 }
 0x10f   : > { %v317_v63 = vadd.f32 %v285_v61, %v189_v59  ;;  %v316_v0 = vadd.f32 %v283_v62, %v188_v60 }
 0x111   : > { %350 = vst.msk [vmem:[%s1330_s1 + $0xf8] sm:$0xff] %vm318_vm1, %v317_v63  ;;  %349 = vst.msk [vmem:[%s1330_s1 + $0xf0] sm:$0xff] %vm318_vm1, %v316_v0 }
 0x112   : > { %v355_v1 = vld [vmem:[%s1330_s1] sm:$0xff]  ;;  %v356_v2 = vld [vmem:[%s1330_s1 + $0x8] sm:$0xff]  ;;  %v357_v3 = vld [vmem:[%s1330_s1 + $0x10] sm:$0xff] }
 0x113   : > { %v387_v4 = vmul.f32 0.00390625, %v355_v1  ;;  %v388_v5 = vmul.f32 0.00390625, %v356_v2  ;;  %v389_v6 = vmul.f32 0.00390625, %v357_v3  ;;  %v358_v7 = vld [vmem:[%s1330_s1 + $0x18] sm:$0xff]  ;;  %v359_v8 = vld [vmem:[%s1330_s1 + $0x20] sm:$0xff]  ;;  %v360_v9 = vld [vmem:[%s1330_s1 + $0x28] sm:$0xff] }
 0x114   : > { %v390_v10 = vmul.f32 0.00390625, %v358_v7  ;;  %v391_v11 = vmul.f32 0.00390625, %v359_v8  ;;  %v392_v12 = vmul.f32 0.00390625, %v360_v9  ;;  %v361_v13 = vld [vmem:[%s1330_s1 + $0x30] sm:$0xff]  ;;  %v362_v14 = vld [vmem:[%s1330_s1 + $0x38] sm:$0xff]  ;;  %v363_v15 = vld [vmem:[%s1330_s1 + $0x40] sm:$0xff] }
 0x115   : > { %419 = vst.msk [vmem:[%s1330_s1] sm:$0xff] %vm318_vm1, %v387_v4  ;;  %420 = vst.msk [vmem:[%s1330_s1 + $0x8] sm:$0xff] %vm318_vm1, %v388_v5  ;;  %v393_v16 = vmul.f32 0.00390625, %v361_v13  ;;  %v394_v17 = vmul.f32 0.00390625, %v362_v14  ;;  %v395_v18 = vmul.f32 0.00390625, %v363_v15  ;;  %v364_v19 = vld [vmem:[%s1330_s1 + $0x48] sm:$0xff] }
 0x116   : > { %421 = vst.msk [vmem:[%s1330_s1 + $0x10] sm:$0xff] %vm318_vm1, %v389_v6  ;;  %v365_v20 = vld [vmem:[%s1330_s1 + $0x50] sm:$0xff]  ;;  %v366_v21 = vld [vmem:[%s1330_s1 + $0x58] sm:$0xff]  ;;  %422 = vst.msk [vmem:[%s1330_s1 + $0x18] sm:$0xff] %vm318_vm1, %v390_v10  ;;  %v396_v22 = vmul.f32 0.00390625, %v364_v19 }
 0x117   : > { %423 = vst.msk [vmem:[%s1330_s1 + $0x20] sm:$0xff] %vm318_vm1, %v391_v11  ;;  %424 = vst.msk [vmem:[%s1330_s1 + $0x28] sm:$0xff] %vm318_vm1, %v392_v12  ;;  %v397_v23 = vmul.f32 0.00390625, %v365_v20  ;;  %v398_v24 = vmul.f32 0.00390625, %v366_v21  ;;  %v367_v25 = vld [vmem:[%s1330_s1 + $0x60] sm:$0xff]  ;;  %v368_v26 = vld [vmem:[%s1330_s1 + $0x68] sm:$0xff] }
 0x118   : > { %v369_v27 = vld [vmem:[%s1330_s1 + $0x70] sm:$0xff]  ;;  %425 = vst.msk [vmem:[%s1330_s1 + $0x30] sm:$0xff] %vm318_vm1, %v393_v16  ;;  %426 = vst.msk [vmem:[%s1330_s1 + $0x38] sm:$0xff] %vm318_vm1, %v394_v17  ;;  %v399_v28 = vmul.f32 0.00390625, %v367_v25  ;;  %v400_v29 = vmul.f32 0.00390625, %v368_v26  ;;  %v370_v31 = vld [vmem:[%s1330_s1 + $0x78] sm:$0xff] }
 0x119   : > { %427 = vst.msk [vmem:[%s1330_s1 + $0x40] sm:$0xff] %vm318_vm1, %v395_v18  ;;  %v401_v30 = vmul.f32 0.00390625, %v369_v27  ;;  %v371_v32 = vld [vmem:[%s1330_s1 + $0x80] sm:$0xff]  ;;  %v372_v33 = vld [vmem:[%s1330_s1 + $0x88] sm:$0xff]  ;;  %428 = vst.msk [vmem:[%s1330_s1 + $0x48] sm:$0xff] %vm318_vm1, %v396_v22  ;;  %v402_v34 = vmul.f32 0.00390625, %v370_v31 }
 0x11a   : > { %429 = vst.msk [vmem:[%s1330_s1 + $0x50] sm:$0xff] %vm318_vm1, %v397_v23  ;;  %430 = vst.msk [vmem:[%s1330_s1 + $0x58] sm:$0xff] %vm318_vm1, %v398_v24  ;;  %v403_v35 = vmul.f32 0.00390625, %v371_v32  ;;  %v404_v36 = vmul.f32 0.00390625, %v372_v33  ;;  %v373_v37 = vld [vmem:[%s1330_s1 + $0x90] sm:$0xff]  ;;  %v374_v38 = vld [vmem:[%s1330_s1 + $0x98] sm:$0xff] }
 0x11b   : > { %v375_v39 = vld [vmem:[%s1330_s1 + $0xa0] sm:$0xff]  ;;  %431 = vst.msk [vmem:[%s1330_s1 + $0x60] sm:$0xff] %vm318_vm1, %v399_v28  ;;  %432 = vst.msk [vmem:[%s1330_s1 + $0x68] sm:$0xff] %vm318_vm1, %v400_v29  ;;  %v405_v40 = vmul.f32 0.00390625, %v373_v37  ;;  %v406_v41 = vmul.f32 0.00390625, %v374_v38  ;;  %v376_v43 = vld [vmem:[%s1330_s1 + $0xa8] sm:$0xff] }
 0x11c   : > { %433 = vst.msk [vmem:[%s1330_s1 + $0x70] sm:$0xff] %vm318_vm1, %v401_v30  ;;  %v407_v42 = vmul.f32 0.00390625, %v375_v39  ;;  %v377_v44 = vld [vmem:[%s1330_s1 + $0xb0] sm:$0xff]  ;;  %v378_v45 = vld [vmem:[%s1330_s1 + $0xb8] sm:$0xff]  ;;  %434 = vst.msk [vmem:[%s1330_s1 + $0x78] sm:$0xff] %vm318_vm1, %v402_v34  ;;  %v408_v46 = vmul.f32 0.00390625, %v376_v43 }
 0x11d   : > { %435 = vst.msk [vmem:[%s1330_s1 + $0x80] sm:$0xff] %vm318_vm1, %v403_v35  ;;  %436 = vst.msk [vmem:[%s1330_s1 + $0x88] sm:$0xff] %vm318_vm1, %v404_v36  ;;  %v409_v47 = vmul.f32 0.00390625, %v377_v44  ;;  %v410_v48 = vmul.f32 0.00390625, %v378_v45  ;;  %v379_v49 = vld [vmem:[%s1330_s1 + $0xc0] sm:$0xff]  ;;  %v380_v50 = vld [vmem:[%s1330_s1 + $0xc8] sm:$0xff] }
 0x11e   : > { %v381_v51 = vld [vmem:[%s1330_s1 + $0xd0] sm:$0xff]  ;;  %437 = vst.msk [vmem:[%s1330_s1 + $0x90] sm:$0xff] %vm318_vm1, %v405_v40  ;;  %438 = vst.msk [vmem:[%s1330_s1 + $0x98] sm:$0xff] %vm318_vm1, %v406_v41  ;;  %v411_v52 = vmul.f32 0.00390625, %v379_v49  ;;  %v412_v53 = vmul.f32 0.00390625, %v380_v50  ;;  %v382_v55 = vld [vmem:[%s1330_s1 + $0xd8] sm:$0xff] }
 0x11f   : > { %439 = vst.msk [vmem:[%s1330_s1 + $0xa0] sm:$0xff] %vm318_vm1, %v407_v42  ;;  %v413_v54 = vmul.f32 0.00390625, %v381_v51  ;;  %v383_v56 = vld [vmem:[%s1330_s1 + $0xe0] sm:$0xff]  ;;  %v384_v57 = vld [vmem:[%s1330_s1 + $0xe8] sm:$0xff]  ;;  %440 = vst.msk [vmem:[%s1330_s1 + $0xa8] sm:$0xff] %vm318_vm1, %v408_v46  ;;  %v414_v58 = vmul.f32 0.00390625, %v382_v55 }
 0x120   : > { %441 = vst.msk [vmem:[%s1330_s1 + $0xb0] sm:$0xff] %vm318_vm1, %v409_v47  ;;  %442 = vst.msk [vmem:[%s1330_s1 + $0xb8] sm:$0xff] %vm318_vm1, %v410_v48  ;;  %v415_v59 = vmul.f32 0.00390625, %v383_v56  ;;  %v416_v60 = vmul.f32 0.00390625, %v384_v57  ;;  %v385_v61 = vld [vmem:[%s1330_s1 + $0xf0] sm:$0xff]  ;;  %v386_v62 = vld [vmem:[%s1330_s1 + $0xf8] sm:$0xff] }
 0x121   : > { %443 = vst.msk [vmem:[%s1330_s1 + $0xc0] sm:$0xff] %vm318_vm1, %v411_v52  ;;  %444 = vst.msk [vmem:[%s1330_s1 + $0xc8] sm:$0xff] %vm318_vm1, %v412_v53  ;;  %v417_v63 = vmul.f32 0.00390625, %v385_v61  ;;  %v418_v0 = vmul.f32 0.00390625, %v386_v62 }
 0x122   : > { %445 = vst.msk [vmem:[%s1330_s1 + $0xd0] sm:$0xff] %vm318_vm1, %v413_v54  ;;  %446 = vst.msk [vmem:[%s1330_s1 + $0xd8] sm:$0xff] %vm318_vm1, %v414_v58 }
 0x123   : > { %447 = vst.msk [vmem:[%s1330_s1 + $0xe0] sm:$0xff] %vm318_vm1, %v415_v59  ;;  %448 = vst.msk [vmem:[%s1330_s1 + $0xe8] sm:$0xff] %vm318_vm1, %v416_v60 }
 0x124   : > { %449 = vst.msk [vmem:[%s1330_s1 + $0xf0] sm:$0xff] %vm318_vm1, %v417_v63  ;;  %450 = vst.msk [vmem:[%s1330_s1 + $0xf8] sm:$0xff] %vm318_vm1, %v418_v0 }
 0x125 PF: > { %p11_p1 = scmp.ge.s32.totalorder %s645_s11, 4   ;;  %s1335_s6 = smov %s598_s7 }
 0x126   : > { %s1336_s7 = smov %s602_s8  ;;  %s1337_s8 = smov %s655_s14 }
 0x127   : > { %s1338_s9 = smov %s645_s11  ;;  %13 = sbr.rel (!%p11_p1) target bundleno = 3 (0x3), region = 68 }
 0x12c   :  { %462 = vsyncpa [#allocation3], 1 }
 0x12d   :  { %464 = vsyncpa [#allocation3 + $0x1], 1 }

</bundles_post_ra>
